<compile_context>
chip_gen: v5e
topology: v5e:2x2
jax: 0.10.0
libtpu: 0.0.40
codegen_flags: <defaults>
</compile_context>

<pallas_src>
import jax
import jax.numpy as jnp
from jax.experimental import pallas as pl
from jax.experimental.pallas import tpu as pltpu


def _rehu_kernel(a, b):
    """Returns a Pallas kernel computing ReHU elementwise for constants a, b."""

    def kernel(x_ref, o_ref):
        x = x_ref[...]
        # sign(x) * (a/2) * x^2  ==  (a/2) * x * |x|   (exact, incl. +-0 / inf)
        quad = (0.5 * a) * x * jnp.abs(x)
        clamped = jnp.clip(quad, 0.0, -b)
        o_ref[...] = jnp.maximum(clamped, x + b)

    return kernel


def _rehu_jnp(x, a, b):
    quad = (0.5 * a) * x * jnp.abs(x)
    return jnp.maximum(jnp.clip(quad, 0.0, -b), x + b)


def _sublane_quantum(dtype):
    itemsize = jnp.dtype(dtype).itemsize
    return {4: 8, 2: 16, 1: 32}.get(itemsize, 8)


def _round_up(v, m):
    return ((v + m - 1) // m) * m


def _choose_cols(n):
    """Widest lane-dense column width (multiple of 128) dividing n exactly."""
    for cols in (4096, 2048, 1024, 512, 256, 128):
        if n % cols == 0:
            return cols
    return None


def _choose_tiling(rows, cols, row_quant, itemsize, target_bytes):
    """Pick (tile_rows, grid_len).

    tile_rows is a multiple of the sublane quantum (or the full row extent),
    sized to ~target_bytes per tile.  The grid length is forced even (and >= 2
    when the data allows) so v7x's two TensorCores both get work; the last
    block may be ragged (Pallas masks it).
    """
    bytes_per_row = cols * itemsize
    budget_rows = max(row_quant,
                      (target_bytes // bytes_per_row) // row_quant * row_quant)
    steps = pl.cdiv(rows, budget_rows)
    if steps == 1 and rows > row_quant:
        steps = 2                      # give both v7x cores work
    if steps > 1 and steps % 2 == 1:
        steps += 1                     # even split across 2 TensorCores

    tile_rows, grid_len = rows, 1
    for _ in range(2):                 # one retry if rounding makes grid odd
        tile_rows = _round_up(pl.cdiv(rows, steps), row_quant)
        if tile_rows >= rows:
            tile_rows = rows           # full extent: always a legal block dim
        grid_len = pl.cdiv(rows, tile_rows)
        if grid_len <= 1 or grid_len % 2 == 0:
            break
        steps = grid_len + 1
    return tile_rows, grid_len


def rehu(x, d, *, target_block_bytes=4 << 20, min_pallas_bytes=64 << 10,
         vmem_limit_bytes=48 << 20, force_kernel=False):
    """Apply ReHU elementwise to x (any shape) using a Pallas TPU kernel."""
    a = 1.0 / d
    b = -d / 2.0

    orig_shape = x.shape
    dtype = x.dtype
    itemsize = jnp.dtype(dtype).itemsize
    n = x.size

    # Tiny activations: fixed pallas_call overhead dwarfs the compute; let XLA
    # fuse the short elementwise chain (or fuse ReHU into its producer).
    if n == 0 or (n * itemsize < min_pallas_bytes and not force_kernel):
        return _rehu_jnp(x, a, b)

    cols = _choose_cols(n)
    if cols is None:
        # n not a multiple of 128: a standalone kernel would need a pad and a
        # slice pass (2 extra full HBM passes); the fused XLA elementwise path
        # is already at the 2-pass HBM roofline, so use it.
        return _rehu_jnp(x, a, b)

    rows = n // cols
    row_quant = _sublane_quantum(dtype)
    tile_rows, grid_len = _choose_tiling(rows, cols, row_quant, itemsize,
                                         target_block_bytes)

    slab = x.reshape(rows, cols)       # contiguous: metadata-only reshape

    out_slab = pl.pallas_call(
        _rehu_kernel(a, b),
        out_shape=jax.ShapeDtypeStruct((rows, cols), dtype),
        grid=(grid_len,),
        in_specs=[pl.BlockSpec((tile_rows, cols), lambda i: (i, 0))],
        out_specs=pl.BlockSpec((tile_rows, cols), lambda i: (i, 0)),
        compiler_params=pltpu.CompilerParams(
            dimension_semantics=("parallel",),
            vmem_limit_bytes=vmem_limit_bytes),
        cost_estimate=pl.CostEstimate(
            flops=7 * n, transcendentals=0, bytes_accessed=2 * n * itemsize),
    )(slab)

    return out_slab.reshape(orig_shape)


def rehu_reference(x, d):
    """Pure-JAX reference matching the PyTorch forward exactly."""
    a = 1.0 / d
    b = -d / 2.0
    quad = jnp.sign(x) * (a / 2.0) * (x ** 2)
    return jnp.maximum(jnp.clip(quad, 0.0, -b), x + b)


if __name__ == "__main__":
    key = jax.random.PRNGKey(0)
    d = 1.0  # ReHU hyperparameter from the module's __init__

    # Small NCHW activation, like what stable_dynamics feeds ReHU.
    x_small = jax.random.normal(key, (2, 4, 16, 16), dtype=jnp.float32) * 2.0
    out_small = jax.block_until_ready(rehu(x_small, d, force_kernel=True))
    ref_small = rehu_reference(x_small, d)
    assert out_small.shape == x_small.shape and out_small.dtype == x_small.dtype
    assert jnp.allclose(out_small, ref_small, atol=1e-6, rtol=1e-6)

    # Larger slab exercising the multi-step (even) grid / megacore path.
    key2 = jax.random.fold_in(key, 1)
    x_big = jax.random.normal(key2, (64, 4, 32, 32), dtype=jnp.float32) * 2.0
    out_big = jax.block_until_ready(rehu(x_big, d))
    ref_big = rehu_reference(x_big, d)
    assert jnp.allclose(out_big, ref_big, atol=1e-6, rtol=1e-6)

    # Awkward row count -> ragged (masked) last block, no pad/slice passes.
    key3 = jax.random.fold_in(key, 2)
    x_ragged = jax.random.normal(key3, (3, 5, 24, 128), dtype=jnp.float32) * 2.0
    out_ragged = jax.block_until_ready(rehu(x_ragged, d))
    ref_ragged = rehu_reference(x_ragged, d)
    assert jnp.allclose(out_ragged, ref_ragged, atol=1e-6, rtol=1e-6)

    # bf16 path (16-sublane quantum, halved HBM traffic).
    x_bf16 = x_big.astype(jnp.bfloat16)
    out_bf16 = jax.block_until_ready(rehu(x_bf16, d))
    ref_bf16 = rehu_reference(x_bf16, d)
    assert out_bf16.dtype == jnp.bfloat16
    assert jnp.allclose(out_bf16.astype(jnp.float32),
                        ref_bf16.astype(jnp.float32), atol=2e-2, rtol=2e-2)

    print("KERNEL_OK")
</pallas_src>

<mosaic_0001>
module attributes {stable_mosaic.version = 11 : i64} {
  func.func @kernel(%arg0: i32, %arg1: memref<1x2048xf32, #tpu.memory_space<vmem>>, %arg2: memref<1x2048xf32, #tpu.memory_space<vmem>>) attributes {dimension_semantics = [#tpu.dimension_semantics<parallel>], iteration_bounds = array<i64: 1>, scalar_prefetch = 0 : i64, scratch_operands = 0 : i64, tpu.core_type = #tpu.core_type<tc>, window_params = [{transform_indices = @transform_0, window_bounds = array<i64: 1, 2048>}, {transform_indices = @transform_1, window_bounds = array<i64: 1, 2048>}]} {
    %c0 = arith.constant 0 : index
    %c0_0 = arith.constant 0 : index
    %0 = vector.load %arg1[%c0, %c0_0] : memref<1x2048xf32, #tpu.memory_space<vmem>>, vector<1x2048xf32>
    %cst = arith.constant 5.000000e-01 : f32
    %1 = vector.broadcast %cst : f32 to vector<1x2048xf32>
    %2 = arith.mulf %1, %0 : vector<1x2048xf32>
    %3 = math.absf %0 : vector<1x2048xf32>
    %4 = arith.mulf %2, %3 : vector<1x2048xf32>
    %cst_1 = arith.constant 0.000000e+00 : f32
    %cst_2 = arith.constant 5.000000e-01 : f32
    %5 = vector.broadcast %cst_1 : f32 to vector<1x2048xf32>
    %6 = arith.maximumf %5, %4 : vector<1x2048xf32>
    %7 = vector.broadcast %cst_2 : f32 to vector<1x2048xf32>
    %8 = arith.minimumf %7, %6 : vector<1x2048xf32>
    %cst_3 = arith.constant -5.000000e-01 : f32
    %9 = vector.broadcast %cst_3 : f32 to vector<1x2048xf32>
    %10 = arith.addf %0, %9 : vector<1x2048xf32>
    %11 = arith.maximumf %8, %10 : vector<1x2048xf32>
    %c0_4 = arith.constant 0 : index
    %c0_5 = arith.constant 0 : index
    %12 = vector.load %arg2[%c0_4, %c0_5] : memref<1x2048xf32, #tpu.memory_space<vmem>>, vector<1x2048xf32>
    tpu.vector_store %arg2[%c0_4, %c0_5], %11 {strides = array<i32>} : memref<1x2048xf32, #tpu.memory_space<vmem>>, vector<1x2048xf32>,
    return
  }
  func.func @transform_0(%arg0: i32) -> (i32, i32) {
    %c0_i32 = arith.constant 0 : i32
    %c0_i32_0 = arith.constant 0 : i32
    return %arg0, %c0_i32 : i32, i32
  }
  func.func @transform_1(%arg0: i32) -> (i32, i32) {
    %c0_i32 = arith.constant 0 : i32
    %c0_i32_0 = arith.constant 0 : i32
    return %arg0, %c0_i32 : i32, i32
  }
}

</mosaic_0001>

<bundles_post_ra>
// kernel: tpu_custom_call.1
= control target key start
LH: loop header
LB: loop body
LE: loop exit
PB: predicated region body
PF: predicated region fallthrough
CT: control target
= control target key end

     0   :  { %6 = vsyncpa [#allocation3], 0  ;;  %s130_s0 = inlined_call_operand.hbm [shape: f32[1,2048], index: 0, kind: input, shape index: {}]   ;;  %s131_s1 = inlined_call_operand.hbm [shape: f32[1,2048], index: 1, kind: output, shape index: {}]  }
   0x1   :  { %7 = vsyncpa [#allocation4], 0  ;;  %s13_s8 = sshll.u32 %s130_s0, 4  ;;  %s112_s9 = smov [#allocation2]   ;;  %s14_s8 = int_to_ptr.hbm [resolvable:$true] %s13_s8 }
   0x2   :  { %s15_s10 = sshll.u32 %s112_s9, 4  ;;  %s16_s10 = int_to_ptr.vmem [resolvable:$true] %s15_s10 }
   0x3   :  { %18 = dma.hbm_to_vmem [thread:$0]  %s14_s8, 256, %s16_s10, [#allocation3]  }
   0x4   :  { %108 = dma.done.wait [#allocation3], 256  }
   0x5   :  { %109 = vsyncadd [#allocation3], 4294967040  ;;  %v23_v0 = vld [vmem:[#allocation2] sm:$0xff]  ;;  %v24_v1 = vld [vmem:[#allocation2 + $0x8] sm:$0xff]  ;;  %s113_s0 = smov [#allocation5]   ;;  %s48_s14 = sshll.u32 %s131_s1, 4  ;;  %s49_s14 = int_to_ptr.hbm [resolvable:$true] %s48_s14 }
   0x6   :  { %v25_v2 = vmul.f32 0.5, %v23_v0  ;;  %v27_v3 = vand.u32 2147483647, %v23_v0  ;;  %v26_v4 = vmul.f32 0.5, %v24_v1  ;;  %v28_v5 = vand.u32 2147483647, %v24_v1 }
   0x7   :  { %v35_v9 = vadd.f32 -0.5, %v23_v0  ;;  %v36_v11 = vadd.f32 -0.5, %v24_v1  ;;  %s46_s11 = sshll.u32 %s113_s0, 4  ;;  %s47_s11 = int_to_ptr.vmem [resolvable:$true] %s46_s11 }
   0x8   :  { %v29_v6 = vmul.f32 %v27_v3, %v25_v2  ;;  %v30_v7 = vmul.f32 %v28_v5, %v26_v4 }
   0xa   :  { %v31_v8 = vmax.f32 %v29_v6, 0.0  ;;  %v32_v10 = vmax.f32 %v30_v7, 0.0 }
   0xc   :  { %v33_v12 = vmin.f32 %v31_v8, 0.5  ;;  %v34_v13 = vmin.f32 %v32_v10, 0.5 }
   0xe   :  { %v37_v14 = vmax.f32 %v33_v12, %v35_v9  ;;  %v38_v15 = vmax.f32 %v34_v13, %v36_v11 }
  0x10   :  { %39 = vst [vmem:[#allocation5] sm:$0xff] %v37_v14 }
  0x11   :  { %40 = vst [vmem:[#allocation5 + $0x8] sm:$0xff] %v38_v15 }
  0x12   :  { %51 = dma.vmem_to_hbm [thread:$0]  %s47_s11, 256, %s49_s14, [#allocation4]  }
  0x13   :  { %110 = dma.done.wait [#allocation4], 256  }
  0x14   :  { %111 = vsyncadd [#allocation4], 4294967040 }
  0x15   :  { %56 = vsyncpa [#allocation3], 1 }
  0x16   :  { %57 = vsyncpa [#allocation4], 1 }

</bundles_post_ra>
